<compile_context>
chip_gen: v6e
topology: v6e:2x2x1
jax: 0.10.0
libtpu: 0.0.40
codegen_flags: <defaults>
</compile_context>

<pallas_src>
import functools

import jax
import jax.numpy as jnp
from jax.experimental import pallas as pl
from jax.experimental.pallas import tpu as pltpu

NUGGET = 1e-5


def _round_up(x, m):
    return ((x + m - 1) // m) * m


def _tpu_info():
    """Best-effort (vmem_capacity_bytes, generation, tensorcores_per_chip)."""
    vmem = 64 * 1024 * 1024  # conservative v7x-sized fallback
    try:
        vmem = int(pltpu.get_tpu_info().vmem_capacity_bytes)
    except Exception:
        pass
    gen, cores = None, 1
    try:
        kind = jax.devices()[0].device_kind.lower()
        for g in (7, 6, 5, 4):
            if f"v{g}" in kind or f"tpu{g}" in kind:
                gen = g
                break
        # v7x, v4 and v5p expose 2 TensorCores per chip.
        if gen in (7, 4) or (gen == 5 and "lite" not in kind and "5e" not in kind):
            cores = 2
    except Exception:
        pass
    return vmem, gen, cores


# ----------------------------------------------------------------------------
# Fast path: whole instance (row) resident in VMEM, single HBM sweep.
# ----------------------------------------------------------------------------
def _whiten2x2_kernel(xr_ref, xi_ref, or_ref, oi_ref, *, n_true, centered):
    xr = xr_ref[...]                       # (tile_r, n_pad) real plane
    xi = xi_ref[...]                       # (tile_r, n_pad) imag plane
    n_pad = xr.shape[-1]
    inv_n = jnp.float32(1.0 / n_true)

    if centered:
        # Two-pass centered statistics: the extra VMEM reads hide entirely
        # under DMA on HBM-bound v5e/v6e and avoid E[x^2]-mean^2 cancellation.
        mean_r = jnp.sum(xr, axis=-1, keepdims=True) * inv_n
        mean_i = jnp.sum(xi, axis=-1, keepdims=True) * inv_n
        cr = xr - mean_r
        ci = xi - mean_i
        if n_pad != n_true:
            # Zero-padded lanes would contribute (-mean)^2; mask them out.
            valid = jax.lax.broadcasted_iota(jnp.int32, xr.shape, 1) < n_true
            crm = jnp.where(valid, cr, 0.0)
            cim = jnp.where(valid, ci, 0.0)
        else:
            crm, cim = cr, ci
        cov_uu = jnp.sum(crm * crm, axis=-1, keepdims=True) * inv_n + NUGGET
        cov_vv = jnp.sum(cim * cim, axis=-1, keepdims=True) * inv_n + NUGGET
        cov_uv = jnp.sum(crm * cim, axis=-1, keepdims=True) * inv_n
    else:
        # Single-pass raw moments (v7x path).  Zero lanes are harmless here
        # because inv_n uses the true spatial size.
        mean_r = jnp.sum(xr, axis=-1, keepdims=True) * inv_n
        mean_i = jnp.sum(xi, axis=-1, keepdims=True) * inv_n
        s_rr = jnp.sum(xr * xr, axis=-1, keepdims=True)
        s_ii = jnp.sum(xi * xi, axis=-1, keepdims=True)
        s_ri = jnp.sum(xr * xi, axis=-1, keepdims=True)
        cov_uu = s_rr * inv_n - mean_r * mean_r + NUGGET
        cov_vv = s_ii * inv_n - mean_i * mean_i + NUGGET
        cov_uv = s_ri * inv_n - mean_r * mean_i

    # ---- inverse 2x2 matrix square root of [[uu, uv], [uv, vv]] -------------
    sqrdet = jnp.sqrt(cov_uu * cov_vv - cov_uv * cov_uv)
    # Exact reciprocal: operand is only (tile_r, 1) so the EUP approximation
    # saved nothing while scaling every output element's error.
    inv_denom = 1.0 / (sqrdet * jnp.sqrt(cov_uu + 2.0 * sqrdet + cov_vv))
    p = (cov_vv + sqrdet) * inv_denom
    q = -cov_uv * inv_denom                          # r == q (symmetric)
    s = (cov_uu + sqrdet) * inv_denom

    if centered:
        or_ref[...] = cr * p + ci * q
        oi_ref[...] = cr * q + ci * s
    else:
        # out = R @ (x - mean) = R @ x - R @ mean (mean folded into offsets).
        off_r = mean_r * p + mean_i * q
        off_i = mean_r * q + mean_i * s
        or_ref[...] = xr * p + xi * q - off_r
        oi_ref[...] = xr * q + xi * s - off_i


# ----------------------------------------------------------------------------
# Large-N fallback: lane-tiled, phase 0 accumulates raw moments in VMEM
# scratch, phase 1 whitens (input read twice, but 8-row blocks of the full
# spatial extent do not fit VMEM on this shape/generation).
# ----------------------------------------------------------------------------
def _whiten2x2_ntiled_kernel(xr_ref, xi_ref, or_ref, oi_ref,
                             sr_ref, si_ref, srr_ref, sii_ref, sri_ref,
                             *, n_true, tile_n):
    phase = pl.program_id(1)
    n_idx = pl.program_id(2)
    inv_n = jnp.float32(1.0 / n_true)

    @pl.when(phase == 0)
    def _stats():
        @pl.when(n_idx == 0)
        def _init():
            sr_ref[...] = jnp.zeros_like(sr_ref)
            si_ref[...] = jnp.zeros_like(si_ref)
            srr_ref[...] = jnp.zeros_like(srr_ref)
            sii_ref[...] = jnp.zeros_like(sii_ref)
            sri_ref[...] = jnp.zeros_like(sri_ref)

        col = n_idx * tile_n + jax.lax.broadcasted_iota(jnp.int32, xr_ref.shape, 1)
        valid = col < n_true                        # masks pad + ragged OOB lanes
        xr = jnp.where(valid, xr_ref[...], 0.0)
        xi = jnp.where(valid, xi_ref[...], 0.0)
        sr_ref[...] += jnp.sum(xr, axis=-1, keepdims=True)
        si_ref[...] += jnp.sum(xi, axis=-1, keepdims=True)
        srr_ref[...] += jnp.sum(xr * xr, axis=-1, keepdims=True)
        sii_ref[...] += jnp.sum(xi * xi, axis=-1, keepdims=True)
        sri_ref[...] += jnp.sum(xr * xi, axis=-1, keepdims=True)

    @pl.when(phase == 1)
    def _whiten():
        mean_r = sr_ref[...] * inv_n
        mean_i = si_ref[...] * inv_n
        cov_uu = srr_ref[...] * inv_n - mean_r * mean_r + NUGGET
        cov_vv = sii_ref[...] * inv_n - mean_i * mean_i + NUGGET
        cov_uv = sri_ref[...] * inv_n - mean_r * mean_i
        sqrdet = jnp.sqrt(cov_uu * cov_vv - cov_uv * cov_uv)
        inv_denom = 1.0 / (sqrdet * jnp.sqrt(cov_uu + 2.0 * sqrdet + cov_vv))
        p = (cov_vv + sqrdet) * inv_denom
        q = -cov_uv * inv_denom
        s = (cov_uu + sqrdet) * inv_denom
        off_r = mean_r * p + mean_i * q
        off_i = mean_r * q + mean_i * s
        xr = xr_ref[...]
        xi = xi_ref[...]
        or_ref[...] = xr * p + xi * q - off_r
        oi_ref[...] = xr * q + xi * s - off_i


# ----------------------------------------------------------------------------
# Wrapper
# ----------------------------------------------------------------------------
def complex_instance_norm_cov(x):
    """x: complex64 [B, C, H, W] -> complex64 [B, C, H, W]."""
    B, C, H, W = x.shape
    rows = B * C
    n_true = H * W

    # TODO(synk): Pallas TPU has no complex refs and lax.bitcast_convert_type
    # rejects complex64, so the real/imag split (and the lax.complex recombine
    # below) stay as wrapper passes; we rely on XLA to fuse them with the
    # reshape / downstream consumer.  Planar real/imag storage at the
    # producer/consumer would remove ~2/3 of the end-to-end HBM traffic.
    xr = jnp.real(x).reshape(rows, n_true).astype(jnp.float32)
    xi = jnp.imag(x).reshape(rows, n_true).astype(jnp.float32)

    vmem_cap, gen, cores = _tpu_info()
    vmem_limit = int(min(vmem_cap * 3 // 4, 112 * 1024 * 1024))
    tile_budget = vmem_limit * 17 // 20          # headroom for compiler temps

    # Lane-dense layout: pad the lane axis to a multiple of 128 (XLA fuses the
    # pad into the real/imag extraction).  Statistics use 1/n_true so zero
    # lanes never perturb the sums.
    n_pad = _round_up(n_true, 128)
    if n_pad != n_true:
        xr = jnp.pad(xr, ((0, 0), (0, n_pad - n_true)))
        xi = jnp.pad(xi, ((0, 0), (0, n_pad - n_true)))

    per_row_vmem = 32 * n_pad                    # 4 f32 planes x 2 buffers
    max_tile_vmem = (tile_budget // per_row_vmem) // 8 * 8
    use_centered = gen is None or gen < 7        # raw moments only on v7x

    out_shape = (jax.ShapeDtypeStruct((rows, n_pad), jnp.float32),
                 jax.ShapeDtypeStruct((rows, n_pad), jnp.float32))

    if max_tile_vmem >= 8:
        # ---- fast path: whole row resident, single HBM sweep ----------------
        rows8 = _round_up(rows, 8)
        bytes_per_row = 16 * n_pad               # read xr/xi + write or/oi
        target_steps = 4 if cores >= 2 else 2
        tile_floor_bw = _round_up(pl.cdiv(8 * 1024 * 1024, bytes_per_row), 8)
        tile_for_steps = _round_up(pl.cdiv(rows, target_steps), 8)
        tile_r = max(8, tile_for_steps, tile_floor_bw)
        tile_r = max(8, min(tile_r, max_tile_vmem, rows8))

        # Ragged last block: OOB rows read garbage but statistics never mix
        # rows and OOB writes are masked, so valid rows are unaffected.
        grid = (pl.cdiv(rows, tile_r),)
        spec = pl.BlockSpec((tile_r, n_pad), lambda i: (i, 0))
        kernel = functools.partial(_whiten2x2_kernel,
                                   n_true=n_true, centered=use_centered)
        or_, oi_ = pl.pallas_call(
            kernel,
            out_shape=out_shape,
            grid=grid,
            in_specs=[spec, spec],
            out_specs=[spec, spec],
            compiler_params=pltpu.CompilerParams(
                dimension_semantics=("parallel",),
                vmem_limit_bytes=vmem_limit,
            ),
        )(xr, xi)
    else:
        # ---- large-N fallback: lane-axis tiling, two phases ------------------
        tile_r = 8
        tile_n = max(128, min((tile_budget // (32 * tile_r)) // 128 * 128,
                              64 * 1024))
        grid = (pl.cdiv(rows, tile_r), 2, pl.cdiv(n_pad, tile_n))
        in_spec = pl.BlockSpec((tile_r, tile_n), lambda i, ph, n: (i, n))
        # Keep the output block pinned to (i, 0) during phase 0 so no garbage
        # block is ever written back; phase 1 writes every block exactly once.
        out_spec = pl.BlockSpec((tile_r, tile_n), lambda i, ph, n: (i, n * ph))
        kernel = functools.partial(_whiten2x2_ntiled_kernel,
                                   n_true=n_true, tile_n=tile_n)
        or_, oi_ = pl.pallas_call(
            kernel,
            out_shape=out_shape,
            grid=grid,
            in_specs=[in_spec, in_spec],
            out_specs=[out_spec, out_spec],
            scratch_shapes=[pltpu.VMEM((tile_r, 1), jnp.float32)] * 5,
            compiler_params=pltpu.CompilerParams(
                dimension_semantics=("parallel", "arbitrary", "arbitrary"),
                vmem_limit_bytes=vmem_limit,
            ),
        )(xr, xi)

    if n_pad != n_true:
        or_ = or_[:, :n_true]
        oi_ = oi_[:, :n_true]
    # TODO(synk): recombine is an extra HBM pass unless XLA fuses it into the
    # consumer; emit planar outputs instead if the consumer allows.
    return jax.lax.complex(or_, oi_).reshape(B, C, H, W)


# ----------------------------------------------------------------------------
# Pure-JAX reference mirroring the PyTorch whiten2x2 semantics.
# ----------------------------------------------------------------------------
def _reference(x):
    axes = (2, 3)
    xr = jnp.real(x).astype(jnp.float32)
    xi = jnp.imag(x).astype(jnp.float32)
    mr = jnp.mean(xr, axis=axes, keepdims=True)
    mi = jnp.mean(xi, axis=axes, keepdims=True)
    cr, ci = xr - mr, xi - mi
    cov_uu = jnp.mean(cr * cr, axis=axes, keepdims=True) + NUGGET
    cov_vv = jnp.mean(ci * ci, axis=axes, keepdims=True) + NUGGET
    cov_uv = jnp.mean(cr * ci, axis=axes, keepdims=True)
    sqrdet = jnp.sqrt(cov_uu * cov_vv - cov_uv * cov_uv)
    denom = sqrdet * jnp.sqrt(cov_uu + 2.0 * sqrdet + cov_vv)
    p = (cov_vv + sqrdet) / denom
    q = -cov_uv / denom
    s = (cov_uu + sqrdet) / denom
    return jax.lax.complex(cr * p + ci * q, cr * q + ci * s)


if __name__ == "__main__":
    B, C, H, W = 2, 4, 16, 16
    key = jax.random.PRNGKey(0)
    kr, ki = jax.random.split(key)
    # Non-zero means exercise the mean-subtraction / offset-fold path.
    x = jax.lax.complex(
        jax.random.normal(kr, (B, C, H, W), dtype=jnp.float32) + 1.5,
        jax.random.normal(ki, (B, C, H, W), dtype=jnp.float32) - 0.75,
    )

    out = jax.block_until_ready(complex_instance_norm_cov(x))
    ref = jax.block_until_ready(_reference(x))

    assert out.shape == (B, C, H, W) and out.dtype == jnp.complex64
    assert jnp.allclose(jnp.real(out), jnp.real(ref), atol=1e-3, rtol=1e-3)
    assert jnp.allclose(jnp.imag(out), jnp.imag(ref), atol=1e-3, rtol=1e-3)

    print("KERNEL_OK")
</pallas_src>

<mosaic_0001>
module attributes {stable_mosaic.version = 11 : i64} {
  func.func @_whiten2x2_kernel(%arg0: i32, %arg1: memref<8x256xf32, #tpu.memory_space<vmem>>, %arg2: memref<8x256xf32, #tpu.memory_space<vmem>>, %arg3: memref<8x256xf32, #tpu.memory_space<vmem>>, %arg4: memref<8x256xf32, #tpu.memory_space<vmem>>) attributes {dimension_semantics = [#tpu.dimension_semantics<parallel>], iteration_bounds = array<i64: 1>, scalar_prefetch = 0 : i64, scratch_operands = 0 : i64, tpu.core_type = #tpu.core_type<tc>, window_params = [{transform_indices = @transform_0, window_bounds = array<i64: 8, 256>}, {transform_indices = @transform_1, window_bounds = array<i64: 8, 256>}, {transform_indices = @transform_2, window_bounds = array<i64: 8, 256>}, {transform_indices = @transform_3, window_bounds = array<i64: 8, 256>}]} {
    %c0 = arith.constant 0 : index
    %c0_0 = arith.constant 0 : index
    %0 = vector.load %arg1[%c0, %c0_0] : memref<8x256xf32, #tpu.memory_space<vmem>>, vector<8x256xf32>
    %c0_1 = arith.constant 0 : index
    %c0_2 = arith.constant 0 : index
    %1 = vector.load %arg2[%c0_1, %c0_2] : memref<8x256xf32, #tpu.memory_space<vmem>>, vector<8x256xf32>
    %cst = arith.constant dense<0.000000e+00> : vector<8xf32>
    %2 = vector.multi_reduction <add>, %0, %cst [1] : vector<8x256xf32> to vector<8xf32>
    %3 = vector.shape_cast %2 : vector<8xf32> to vector<8x1xf32>
    %cst_3 = arith.constant 3.906250e-03 : f32
    %4 = vector.broadcast %cst_3 : f32 to vector<8x1xf32>
    %5 = arith.mulf %3, %4 : vector<8x1xf32>
    %cst_4 = arith.constant dense<0.000000e+00> : vector<8xf32>
    %6 = vector.multi_reduction <add>, %1, %cst_4 [1] : vector<8x256xf32> to vector<8xf32>
    %7 = vector.shape_cast %6 : vector<8xf32> to vector<8x1xf32>
    %cst_5 = arith.constant 3.906250e-03 : f32
    %8 = vector.broadcast %cst_5 : f32 to vector<8x1xf32>
    %9 = arith.mulf %7, %8 : vector<8x1xf32>
    %10 = vector.broadcast %5 : vector<8x1xf32> to vector<8x256xf32>
    %11 = arith.subf %0, %10 : vector<8x256xf32>
    %12 = vector.broadcast %9 : vector<8x1xf32> to vector<8x256xf32>
    %13 = arith.subf %1, %12 : vector<8x256xf32>
    %14 = arith.mulf %11, %11 : vector<8x256xf32>
    %cst_6 = arith.constant dense<0.000000e+00> : vector<8xf32>
    %15 = vector.multi_reduction <add>, %14, %cst_6 [1] : vector<8x256xf32> to vector<8xf32>
    %16 = vector.shape_cast %15 : vector<8xf32> to vector<8x1xf32>
    %cst_7 = arith.constant 3.906250e-03 : f32
    %17 = vector.broadcast %cst_7 : f32 to vector<8x1xf32>
    %18 = arith.mulf %16, %17 : vector<8x1xf32>
    %cst_8 = arith.constant 9.99999974E-6 : f32
    %19 = vector.broadcast %cst_8 : f32 to vector<8x1xf32>
    %20 = arith.addf %18, %19 : vector<8x1xf32>
    %21 = arith.mulf %13, %13 : vector<8x256xf32>
    %cst_9 = arith.constant dense<0.000000e+00> : vector<8xf32>
    %22 = vector.multi_reduction <add>, %21, %cst_9 [1] : vector<8x256xf32> to vector<8xf32>
    %23 = vector.shape_cast %22 : vector<8xf32> to vector<8x1xf32>
    %cst_10 = arith.constant 3.906250e-03 : f32
    %24 = vector.broadcast %cst_10 : f32 to vector<8x1xf32>
    %25 = arith.mulf %23, %24 : vector<8x1xf32>
    %cst_11 = arith.constant 9.99999974E-6 : f32
    %26 = vector.broadcast %cst_11 : f32 to vector<8x1xf32>
    %27 = arith.addf %25, %26 : vector<8x1xf32>
    %28 = arith.mulf %11, %13 : vector<8x256xf32>
    %cst_12 = arith.constant dense<0.000000e+00> : vector<8xf32>
    %29 = vector.multi_reduction <add>, %28, %cst_12 [1] : vector<8x256xf32> to vector<8xf32>
    %30 = vector.shape_cast %29 : vector<8xf32> to vector<8x1xf32>
    %cst_13 = arith.constant 3.906250e-03 : f32
    %31 = vector.broadcast %cst_13 : f32 to vector<8x1xf32>
    %32 = arith.mulf %30, %31 : vector<8x1xf32>
    %33 = arith.mulf %20, %27 : vector<8x1xf32>
    %34 = arith.mulf %32, %32 : vector<8x1xf32>
    %35 = arith.subf %33, %34 : vector<8x1xf32>
    %36 = math.sqrt %35 : vector<8x1xf32>
    %cst_14 = arith.constant 2.000000e+00 : f32
    %37 = vector.broadcast %cst_14 : f32 to vector<8x1xf32>
    %38 = arith.mulf %37, %36 : vector<8x1xf32>
    %39 = arith.addf %20, %38 : vector<8x1xf32>
    %40 = arith.addf %39, %27 : vector<8x1xf32>
    %41 = math.sqrt %40 : vector<8x1xf32>
    %42 = arith.mulf %36, %41 : vector<8x1xf32>
    %cst_15 = arith.constant 1.000000e+00 : f32
    %43 = vector.broadcast %cst_15 : f32 to vector<8x1xf32>
    %44 = arith.divf %43, %42 : vector<8x1xf32>
    %45 = arith.addf %27, %36 : vector<8x1xf32>
    %46 = arith.mulf %45, %44 : vector<8x1xf32>
    %cst_16 = arith.constant 0.000000e+00 : f32
    %47 = vector.broadcast %cst_16 : f32 to vector<8x1xf32>
    %48 = arith.subf %47, %32 : vector<8x1xf32>
    %49 = arith.mulf %48, %44 : vector<8x1xf32>
    %50 = arith.addf %20, %36 : vector<8x1xf32>
    %51 = arith.mulf %50, %44 : vector<8x1xf32>
    %52 = vector.broadcast %46 : vector<8x1xf32> to vector<8x256xf32>
    %53 = arith.mulf %11, %52 : vector<8x256xf32>
    %54 = vector.broadcast %49 : vector<8x1xf32> to vector<8x256xf32>
    %55 = arith.mulf %13, %54 : vector<8x256xf32>
    %56 = arith.addf %53, %55 : vector<8x256xf32>
    %c0_17 = arith.constant 0 : index
    %c0_18 = arith.constant 0 : index
    %57 = vector.load %arg3[%c0_17, %c0_18] : memref<8x256xf32, #tpu.memory_space<vmem>>, vector<8x256xf32>
    tpu.vector_store %arg3[%c0_17, %c0_18], %56 {strides = array<i32>} : memref<8x256xf32, #tpu.memory_space<vmem>>, vector<8x256xf32>,
    %58 = vector.broadcast %49 : vector<8x1xf32> to vector<8x256xf32>
    %59 = arith.mulf %11, %58 : vector<8x256xf32>
    %60 = vector.broadcast %51 : vector<8x1xf32> to vector<8x256xf32>
    %61 = arith.mulf %13, %60 : vector<8x256xf32>
    %62 = arith.addf %59, %61 : vector<8x256xf32>
    %c0_19 = arith.constant 0 : index
    %c0_20 = arith.constant 0 : index
    %63 = vector.load %arg4[%c0_19, %c0_20] : memref<8x256xf32, #tpu.memory_space<vmem>>, vector<8x256xf32>
    tpu.vector_store %arg4[%c0_19, %c0_20], %62 {strides = array<i32>} : memref<8x256xf32, #tpu.memory_space<vmem>>, vector<8x256xf32>,
    return
  }
  func.func @transform_0(%arg0: i32) -> (i32, i32) {
    %c0_i32 = arith.constant 0 : i32
    %c0_i32_0 = arith.constant 0 : i32
    return %arg0, %c0_i32 : i32, i32
  }
  func.func @transform_1(%arg0: i32) -> (i32, i32) {
    %c0_i32 = arith.constant 0 : i32
    %c0_i32_0 = arith.constant 0 : i32
    return %arg0, %c0_i32 : i32, i32
  }
  func.func @transform_2(%arg0: i32) -> (i32, i32) {
    %c0_i32 = arith.constant 0 : i32
    %c0_i32_0 = arith.constant 0 : i32
    return %arg0, %c0_i32 : i32, i32
  }
  func.func @transform_3(%arg0: i32) -> (i32, i32) {
    %c0_i32 = arith.constant 0 : i32
    %c0_i32_0 = arith.constant 0 : i32
    return %arg0, %c0_i32 : i32, i32
  }
}

</mosaic_0001>

<bundles_post_ra>
// kernel: tpu_custom_call.1
= control target key start
LH: loop header
LB: loop body
LE: loop exit
PB: predicated region body
PF: predicated region fallthrough
CT: control target
= control target key end

     0   :  { %9 = vsyncpa [#allocation3], 0  ;;  %s298_s0 = inlined_call_operand.hbm [shape: f32[8,256], index: 0, kind: input, shape index: {}]   ;;  %s299_s1 = inlined_call_operand.hbm [shape: f32[8,256], index: 1, kind: input, shape index: {}]   ;;  %s300_s2 = inlined_call_operand.hbm [shape: f32[8,256], index: 2, kind: output, shape index: {0}]   ;;  %s301_s3 = inlined_call_operand.hbm [shape: f32[8,256], index: 3, kind: output, shape index: {1}]  }
   0x1   :  { %10 = vsyncpa [#allocation6], 0 }
   0x2   :  { %11 = vsyncpa [#allocation4], 0 }
   0x3   :  { %12 = vsyncpa [#allocation9], 0  ;;  %s248_s12 = smov [#allocation2]   ;;  %s249_s14 = smov [#allocation5]  }
   0x4   :  { %s19_s13 = sshll.u32 %s248_s12, 4  ;;  %s29_s15 = sshll.u32 %s249_s14, 4  ;;  %s20_s13 = int_to_ptr.vmem [resolvable:$true] %s19_s13  ;;  %s30_s15 = int_to_ptr.vmem [resolvable:$true] %s29_s15 }
   0x5   :  { %s168_s16 = scalar_lea.vmem %s20_s13, 256  ;;  %p173_p1 = scmp.lt.s32.totalorder %s20_s13, %s20_s13 }
   0x6   :  { %p169_p0 = scmp.ne.s32.totalorder %s20_s13, %s168_s16  ;;  %p174_p2 = scmp.lt.s32.totalorder %s168_s16, %s168_s16 }
   0x8   :  { %p175_p3 = por %p174_p2, %p173_p1 }
   0xa   :  { %p176_p4 = pnand %p175_p3, %p169_p0 }
   0xc   :  { %179 = shalt.err (!%p176_p4)
}
   0xd   :  { %22 = dma.hbm_to_vmem [thread:$0]  %s298_s0, 256, %s20_s13, [#allocation3]  }
   0xe   :  { %s188_s19 = scalar_lea.vmem %s30_s15, 256  ;;  %p193_p6 = scmp.lt.s32.totalorder %s30_s15, %s30_s15 }
   0xf   :  { %p189_p5 = scmp.ne.s32.totalorder %s30_s15, %s188_s19  ;;  %p194_p7 = scmp.lt.s32.totalorder %s188_s19, %s188_s19 }
  0x11   :  { %p195_p8 = por %p194_p7, %p193_p6 }
  0x13   :  { %p196_p9 = pnand %p195_p8, %p189_p5 }
  0x15   :  { %199 = shalt.err (!%p196_p9)
}
  0x16   :  { %32 = dma.hbm_to_vmem [thread:$0]  %s299_s1, 256, %s30_s15, [#allocation6]  }
  0x17   :  { %240 = dma.done.wait [#allocation3], 256  }
  0x18   :  { %241 = vsyncadd [#allocation3], 4294967040 }
  0x19   :  { %242 = dma.done.wait [#allocation6], 256  }
  0x1a   :  { %243 = vsyncadd [#allocation6], 4294967040  ;;  %v39_v0 = vld [vmem:[#allocation2] sm:$0xff]  ;;  %v40_v1 = vld [vmem:[#allocation2 + $0x8] sm:$0xff]  ;;  %s250_s0 = smov [#allocation7]   ;;  %s251_s22 = smov [#allocation8]  }
  0x1b   :  { %v41_v2 = vld [vmem:[#allocation5] sm:$0xff]  ;;  %v43_v3 = vadd.f32 %v40_v1, %v39_v0  ;;  %v42_v4 = vld [vmem:[#allocation5 + $0x8] sm:$0xff]  ;;  %s126_s1 = sshll.u32 %s250_s0, 4  ;;  %s136_s23 = sshll.u32 %s251_s22, 4  ;;  %s127_s1 = int_to_ptr.vmem [resolvable:$true] %s126_s1  ;;  %s137_s23 = int_to_ptr.vmem [resolvable:$true] %s136_s23 }
  0x1c   :  { %v47_v5 = vadd.f32 %v42_v4, %v41_v2  ;;  %s200_s24 = scalar_lea.vmem %s127_s1, 256  ;;  %p205_p11 = scmp.lt.s32.totalorder %s127_s1, %s127_s1 }
  0x1d   :  { %44 = vadd.xlane.f32.xlu0 %v43_v3  ;;  %p201_p10 = scmp.ne.s32.totalorder %s127_s1, %s200_s24  ;;  %p206_p12 = scmp.lt.s32.totalorder %s200_s24, %s200_s24 }
  0x1f   :  { %p207_p13 = por %p206_p12, %p205_p11 }
  0x21   :  { %48 = vadd.xlane.f32.xlu0 %v47_v5  ;;  %p208_p0 = pnand %p207_p13, %p201_p10 }
  0xa6   :  { %v45_v6 = vpop.xlane.xlu0 %44 }
  0xa7   :  { %v46_v7 = vmul.f32 0.00390625, %v45_v6 }
  0xa9   :  { %v278_v8 = vsub.f32 %v39_v0, %v46_v7  ;;  %v280_v9 = vsub.f32 %v40_v1, %v46_v7 }
  0xaa   :  { %v49_v10 = vpop.xlane.xlu0 %48 }
  0xab   :  { %v50_v11 = vmul.f32 0.00390625, %v49_v10  ;;  %v55_v12 = vmul.f32 %v278_v8, %v278_v8  ;;  %v56_v13 = vmul.f32 %v280_v9, %v280_v9 }
  0xad   :  { %v53_v14 = vsub.f32 %v41_v2, %v50_v11  ;;  %v54_v15 = vsub.f32 %v42_v4, %v50_v11  ;;  %v57_v16 = vadd.f32 %v56_v13, %v55_v12 }
  0xaf   :  { %58 = vadd.xlane.f32.xlu1 %v57_v16  ;;  %v69_v17 = vmul.f32 %v53_v14, %v278_v8  ;;  %v70_v18 = vmul.f32 %v54_v15, %v280_v9  ;;  %v62_v19 = vmul.f32 %v53_v14, %v53_v14  ;;  %v63_v20 = vmul.f32 %v54_v15, %v54_v15 }
  0xb1   :  { %v71_v21 = vadd.f32 %v70_v18, %v69_v17  ;;  %v64_v22 = vadd.f32 %v63_v20, %v62_v19 }
  0xb3   :  { %72 = vadd.xlane.f32.xlu0 %v71_v21  ;;  %65 = vadd.xlane.f32.xlu1 %v64_v22 }
 0x138   :  { %v59_v23 = vpop.xlane.xlu1 %58 }
 0x139   :  { %v60_v24 = vmul.f32 0.00390625, %v59_v23 }
 0x13b   :  { %v61_v29 = vadd.f32 1e-05, %v60_v24 }
 0x13c   :  { %v73_v25 = vpop.xlane.xlu0 %72  ;;  %v66_v26 = vpop.xlane.xlu1 %65 }
 0x13d   :  { %v74_v27 = vmul.f32 0.00390625, %v73_v25  ;;  %v67_v28 = vmul.f32 0.00390625, %v66_v26 }
 0x13f   :  { %v68_v30 = vadd.f32 1e-05, %v67_v28  ;;  %v76_v31 = vmul.f32 %v74_v27, %v74_v27  ;;  %v100_v48 = vsub.f32 0.0, %v74_v27 }
 0x141   :  { %v75_v32 = vmul.f32 %v68_v30, %v61_v29 }
 0x143   :  { %v77_v33 = vsub.f32 %v75_v32, %v76_v31 }
 0x145   :  { %154 = vrsqrt.f32 %v77_v33  ;;  %vm80_vm0 = vcmp.eq.f32.partialorder %v77_v33, inf  ;;  %v83_v36 = vand.u32 2147483648, %v77_v33  ;;  %vm82_vm1 = vcmp.eq.f32.partialorder %v77_v33, 0.0 }
 0x152   :  { %v155_v34 = vpop.eup %154 }
 0x153   :  { %v79_v35 = vmul.f32 %v155_v34, %v77_v33 }
 0x155   :  { %v81_v37 = vsel %vm80_vm0, %v77_v33, %v79_v35 }
 0x156   :  { %v84_v38 = vsel %vm82_vm1, %v83_v36, %v81_v37 }
 0x157   :  { %v85_v39 = vmul.f32 2.0, %v84_v38  ;;  %v98_v49 = vadd.f32 %v84_v38, %v68_v30  ;;  %v102_v50 = vadd.f32 %v84_v38, %v61_v29 }
 0x159   :  { %v86_v40 = vadd.f32 %v85_v39, %v61_v29 }
 0x15b   :  { %v87_v41 = vadd.f32 %v86_v40, %v68_v30 }
 0x15d   :  { %156 = vrsqrt.f32 %v87_v41  ;;  %vm90_vm2 = vcmp.eq.f32.partialorder %v87_v41, inf  ;;  %v93_v44 = vand.u32 2147483648, %v87_v41  ;;  %vm92_vm3 = vcmp.eq.f32.partialorder %v87_v41, 0.0 }
 0x16a   :  { %v157_v42 = vpop.eup %156 }
 0x16b   :  { %v89_v43 = vmul.f32 %v157_v42, %v87_v41 }
 0x16d   :  { %v91_v45 = vsel %vm90_vm2, %v87_v41, %v89_v43 }
 0x16e   :  { %v94_v46 = vsel %vm92_vm3, %v93_v44, %v91_v45 }
 0x16f   :  { %v95_v47 = vmul.f32 %v94_v46, %v84_v38 }
 0x171   :  { %158 = vrcp.f32 %v95_v47 }
 0x17e   :  { %v159_v51 = vpop.eup %158 }
 0x17f   :  { %v99_v52 = vmul.f32 %v159_v51, %v98_v49  ;;  %v101_v53 = vmul.f32 %v159_v51, %v100_v48  ;;  %v103_v54 = vmul.f32 %v159_v51, %v102_v50 }
 0x181   :  { %v104_v55 = vmul.f32 %v99_v52, %v278_v8  ;;  %v105_v56 = vmul.f32 %v99_v52, %v280_v9  ;;  %v106_v57 = vmul.f32 %v101_v53, %v53_v14  ;;  %v107_v58 = vmul.f32 %v101_v53, %v54_v15 }
 0x182   :  { %v112_v59 = vmul.f32 %v101_v53, %v278_v8  ;;  %v113_v60 = vmul.f32 %v101_v53, %v280_v9  ;;  %v114_v61 = vmul.f32 %v103_v54, %v53_v14  ;;  %v115_v62 = vmul.f32 %v103_v54, %v54_v15 }
 0x183   :  { %v108_v63 = vadd.f32 %v106_v57, %v104_v55  ;;  %v109_v0 = vadd.f32 %v107_v58, %v105_v56 }
 0x184   :  { %v116_v1 = vadd.f32 %v114_v61, %v112_v59  ;;  %v117_v2 = vadd.f32 %v115_v62, %v113_v60 }
 0x185   :  { %110 = vst [vmem:[#allocation7] sm:$0xff] %v108_v63  ;;  %111 = vst [vmem:[#allocation7 + $0x8] sm:$0xff] %v109_v0 }
 0x186   :  { %211 = shalt.err (!%p208_p0)
}
 0x187   :  { %129 = dma.vmem_to_hbm [thread:$0]  %s127_s1, 256, %s300_s2, [#allocation4]   ;;  %118 = vst [vmem:[#allocation8] sm:$0xff] %v116_v1  ;;  %119 = vst [vmem:[#allocation8 + $0x8] sm:$0xff] %v117_v2 }
 0x188   :  { %s220_s27 = scalar_lea.vmem %s137_s23, 256  ;;  %p225_p2 = scmp.lt.s32.totalorder %s137_s23, %s137_s23 }
 0x189   :  { %p221_p1 = scmp.ne.s32.totalorder %s137_s23, %s220_s27  ;;  %p226_p3 = scmp.lt.s32.totalorder %s220_s27, %s220_s27 }
 0x18b   :  { %p227_p4 = por %p226_p3, %p225_p2 }
 0x18d   :  { %p228_p5 = pnand %p227_p4, %p221_p1 }
 0x18f   :  { %231 = shalt.err (!%p228_p5)
}
 0x190   :  { %139 = dma.vmem_to_hbm [thread:$0]  %s137_s23, 256, %s301_s3, [#allocation9]  }
 0x191   :  { %244 = dma.done.wait [#allocation4], 256  }
 0x192   :  { %245 = vsyncadd [#allocation4], 4294967040 }
 0x193   :  { %246 = dma.done.wait [#allocation9], 256  }
 0x194   :  { %247 = vsyncadd [#allocation9], 4294967040 }
 0x195   :  { %146 = vsyncpa [#allocation3], 1 }
 0x196   :  { %147 = vsyncpa [#allocation6], 1 }
 0x197   :  { %148 = vsyncpa [#allocation4], 1 }
 0x198   :  { %149 = vsyncpa [#allocation9], 1 }

</bundles_post_ra>
